<compile_context>
chip_gen: v5e
topology: v5e:2x2
jax: 0.10.0
libtpu: 0.0.40
codegen_flags: <defaults>
</compile_context>

<pallas_src>
import functools

import jax
import jax.numpy as jnp
from jax.experimental import pallas as pl
from jax.experimental.pallas import tpu as pltpu


def self_attention_kernel(x_ref, w_qkv_ref, o_ref, *, inv_scale):
    bt, s, d_in = x_ref.shape
    d_pad = w_qkv_ref.shape[1] // 3

    # Fused QKV projection: one MXU pass with M = bt*s rows, N = 3*d_pad cols.
    x2 = x_ref[...].reshape(bt * s, d_in)
    qkv = jnp.dot(x2, w_qkv_ref[...], preferred_element_type=jnp.float32)
    qkv = qkv.reshape(bt, s, 3 * d_pad)

    # Lane-aligned (multiple-of-128) column slices.
    q = qkv[:, :, :d_pad] * inv_scale          # fold 1/sqrt(D_out) into Q
    k = qkv[:, :, d_pad:2 * d_pad]
    v = qkv[:, :, 2 * d_pad:]

    # scores = Q @ K^T (trans-B via dot_general; no XLU transpose of K).
    scores = jnp.einsum("bqd,bkd->bqk", q, k,
                        preferred_element_type=jnp.float32)   # (bt, s, s)

    # Numerically stable softmax; division replaced by EUP reciprocal.
    scores = scores - jnp.max(scores, axis=-1, keepdims=True)
    p = jnp.exp(scores)
    denom = jnp.sum(p, axis=-1, keepdims=True)                # (bt, s, 1)

    out = jnp.einsum("bqk,bkd->bqd", p, v,
                     preferred_element_type=jnp.float32)      # (bt, s, d_pad)
    out = out * pl.reciprocal(denom, approx=True)
    o_ref[...] = out.astype(o_ref.dtype)


def self_attention(x, wq, wk, wv, output_dim):
    """x: (B, S, D_in); wq/wk/wv: (D_in, D_out). Returns (B, S, D_out)."""
    B, S, D_in = x.shape
    D_out = wq.shape[1]
    inv_scale = 1.0 / (float(output_dim) ** 0.5)

    # Pad the projection output dim to a lane multiple so Q/K/V and the output
    # tile are lane-dense (zero columns are exact no-ops for QK^T and PV).
    d_pad = pl.cdiv(D_out, 128) * 128
    pad = d_pad - D_out
    if pad:
        z = jnp.zeros((D_in, pad), dtype=wq.dtype)
        wq_p = jnp.concatenate([wq, z], axis=1)
        wk_p = jnp.concatenate([wk, z], axis=1)
        wv_p = jnp.concatenate([wv, z], axis=1)
    else:
        wq_p, wk_p, wv_p = wq, wk, wv
    w_qkv = jnp.concatenate([wq_p, wk_p, wv_p], axis=1)        # (D_in, 3*d_pad)

    # Batch tiling: aim for ~256 matmul rows per step, but keep >= 2 grid
    # steps (when B >= 2) so the parallel axis can shard across v7x's 2 TCs.
    block_b = max(1, min(B, 256 // max(S, 1)))
    if B >= 2:
        block_b = min(block_b, pl.cdiv(B, 2))
    while B % block_b != 0:
        block_b -= 1
    grid = (B // block_b,)

    kernel = functools.partial(self_attention_kernel, inv_scale=inv_scale)

    out_padded = pl.pallas_call(
        kernel,
        out_shape=jax.ShapeDtypeStruct((B, S, d_pad), x.dtype),
        grid=grid,
        in_specs=[
            pl.BlockSpec((block_b, S, D_in), lambda b: (b, 0, 0)),
            pl.BlockSpec((D_in, 3 * d_pad), lambda b: (0, 0)),
        ],
        out_specs=pl.BlockSpec((block_b, S, d_pad), lambda b: (b, 0, 0)),
        compiler_params=pltpu.CompilerParams(
            dimension_semantics=("parallel",),
            vmem_limit_bytes=48 * 1024 * 1024,
        ),
    )(x, w_qkv)

    return out_padded[..., :D_out] if pad else out_padded


def self_attention_ref(x, wq, wk, wv, output_dim):
    """Pure-JAX reference mirroring the PyTorch forward."""
    scale = float(output_dim) ** 0.5
    q = x @ wq
    k = x @ wk
    v = x @ wv
    s = (q @ jnp.swapaxes(k, 1, 2)) / scale
    p = jax.nn.softmax(s, axis=-1)
    return p @ v


if __name__ == "__main__":
    B, S = 2, 8
    input_dim, output_dim = 32, 32

    key = jax.random.PRNGKey(0)
    kx, kq, kk, kv = jax.random.split(key, 4)

    x = jax.random.normal(kx, (B, S, input_dim), dtype=jnp.float32)

    # nn.Linear(input_dim, output_dim, bias=False) weight has shape
    # (output_dim, input_dim); we store the transposed (input_dim, output_dim)
    # version. Deterministic init akin to Kaiming-uniform bound 1/sqrt(fan_in).
    bound = 1.0 / (input_dim ** 0.5)
    wq = jax.random.uniform(kq, (input_dim, output_dim), jnp.float32, -bound, bound)
    wk = jax.random.uniform(kk, (input_dim, output_dim), jnp.float32, -bound, bound)
    wv = jax.random.uniform(kv, (input_dim, output_dim), jnp.float32, -bound, bound)

    out = self_attention(x, wq, wk, wv, output_dim)
    out = jax.block_until_ready(out)

    ref = self_attention_ref(x, wq, wk, wv, output_dim)
    assert out.shape == (B, S, output_dim)
    # Tolerance loosened slightly vs. exact-division version because the
    # softmax denominator uses the EUP approximate reciprocal.
    assert jnp.allclose(out, ref, atol=2e-3, rtol=2e-3), (
        float(jnp.max(jnp.abs(out - ref)))
    )

    print("KERNEL_OK")
</pallas_src>

<mosaic_0001>
module attributes {stable_mosaic.version = 11 : i64} {
  func.func @self_attention_kernel(%arg0: i32, %arg1: memref<1x8x32xf32, #tpu.memory_space<vmem>>, %arg2: memref<32x384xf32, #tpu.memory_space<vmem>>, %arg3: memref<1x8x128xf32, #tpu.memory_space<vmem>>) attributes {dimension_semantics = [#tpu.dimension_semantics<parallel>], iteration_bounds = array<i64: 2>, scalar_prefetch = 0 : i64, scratch_operands = 0 : i64, tpu.core_type = #tpu.core_type<tc>, window_params = [{transform_indices = @transform_0, window_bounds = array<i64: 1, 8, 32>}, {pipeline_mode = #tpu.pipeline_mode<synchronous>, transform_indices = @transform_1, window_bounds = array<i64: 32, 384>}, {transform_indices = @transform_2, window_bounds = array<i64: 1, 8, 128>}]} {
    %c0 = arith.constant 0 : index
    %c0_0 = arith.constant 0 : index
    %c0_1 = arith.constant 0 : index
    %0 = vector.load %arg1[%c0, %c0_0, %c0_1] : memref<1x8x32xf32, #tpu.memory_space<vmem>>, vector<1x8x32xf32>
    %1 = vector.shape_cast %0 : vector<1x8x32xf32> to vector<8x32xf32>
    %c0_2 = arith.constant 0 : index
    %c0_3 = arith.constant 0 : index
    %2 = vector.load %arg2[%c0_2, %c0_3] : memref<32x384xf32, #tpu.memory_space<vmem>>, vector<32x384xf32>
    %cst = arith.constant dense<0.000000e+00> : vector<8x384xf32>
    %3 = tpu.matmul %1, %2, %cst {dimension_numbers = #tpu.dot_dimension_numbers<[1], [0], [0], [1], [0, 0, 1, 1], [], []>} : vector<8x32xf32>, vector<32x384xf32>, vector<8x384xf32> -> vector<8x384xf32>
    %4 = vector.shape_cast %3 : vector<8x384xf32> to vector<1x8x384xf32>
    %5 = vector.extract_strided_slice %4 {offsets = [0, 0, 0], sizes = [1, 8, 128], strides = [1, 1, 1]} : vector<1x8x384xf32> to vector<1x8x128xf32>
    %cst_4 = arith.constant 0.176776692 : f32
    %6 = vector.broadcast %cst_4 : f32 to vector<1x8x128xf32>
    %7 = arith.mulf %5, %6 : vector<1x8x128xf32>
    %8 = vector.extract_strided_slice %4 {offsets = [0, 0, 128], sizes = [1, 8, 128], strides = [1, 1, 1]} : vector<1x8x384xf32> to vector<1x8x128xf32>
    %9 = vector.extract_strided_slice %4 {offsets = [0, 0, 256], sizes = [1, 8, 128], strides = [1, 1, 1]} : vector<1x8x384xf32> to vector<1x8x128xf32>
    "tpu.trace_start"() <{level = 10 : i32, message = "bqd,bkd->bqk"}> : () -> ()
    %cst_5 = arith.constant dense<0.000000e+00> : vector<1x8x8xf32>
    %10 = tpu.matmul %7, %8, %cst_5 {dimension_numbers = #tpu.dot_dimension_numbers<[2], [2], [1], [1], [0, 0, 0, 1, 1, 1], [0], [0]>} : vector<1x8x128xf32>, vector<1x8x128xf32>, vector<1x8x8xf32> -> vector<1x8x8xf32>
    "tpu.trace_stop"() : () -> ()
    %cst_6 = arith.constant dense<0xFF800000> : vector<1x8xf32>
    %11 = vector.multi_reduction <maximumf>, %10, %cst_6 [2] : vector<1x8x8xf32> to vector<1x8xf32>
    %12 = vector.shape_cast %11 : vector<1x8xf32> to vector<1x8x1xf32>
    %13 = vector.broadcast %12 : vector<1x8x1xf32> to vector<1x8x8xf32>
    %14 = arith.subf %10, %13 : vector<1x8x8xf32>
    %15 = math.exp %14 : vector<1x8x8xf32>
    %cst_7 = arith.constant dense<0.000000e+00> : vector<1x8xf32>
    %16 = vector.multi_reduction <add>, %15, %cst_7 [2] : vector<1x8x8xf32> to vector<1x8xf32>
    %17 = vector.shape_cast %16 : vector<1x8xf32> to vector<1x8x1xf32>
    "tpu.trace_start"() <{level = 10 : i32, message = "bqk,bkd->bqd"}> : () -> ()
    %cst_8 = arith.constant dense<0.000000e+00> : vector<1x8x128xf32>
    %18 = tpu.matmul %15, %9, %cst_8 {dimension_numbers = #tpu.dot_dimension_numbers<[2], [1], [1], [2], [0, 0, 0, 1, 1, 2], [0], [0]>} : vector<1x8x8xf32>, vector<1x8x128xf32>, vector<1x8x128xf32> -> vector<1x8x128xf32>
    "tpu.trace_stop"() : () -> ()
    %19 = tpu.reciprocal %17 {approx = true} : vector<1x8x1xf32> -> vector<1x8x1xf32>
    %20 = vector.broadcast %19 : vector<1x8x1xf32> to vector<1x8x128xf32>
    %21 = arith.mulf %18, %20 : vector<1x8x128xf32>
    %c0_9 = arith.constant 0 : index
    %c0_10 = arith.constant 0 : index
    %c0_11 = arith.constant 0 : index
    %22 = vector.load %arg3[%c0_9, %c0_10, %c0_11] : memref<1x8x128xf32, #tpu.memory_space<vmem>>, vector<1x8x128xf32>
    tpu.vector_store %arg3[%c0_9, %c0_10, %c0_11], %21 {strides = array<i32>} : memref<1x8x128xf32, #tpu.memory_space<vmem>>, vector<1x8x128xf32>,
    return
  }
  func.func @transform_0(%arg0: i32) -> (i32, i32, i32) {
    %c0_i32 = arith.constant 0 : i32
    %c0_i32_0 = arith.constant 0 : i32
    %c0_i32_1 = arith.constant 0 : i32
    return %arg0, %c0_i32, %c0_i32_0 : i32, i32, i32
  }
  func.func @transform_1(%arg0: i32) -> (i32, i32) {
    %c0_i32 = arith.constant 0 : i32
    %c0_i32_0 = arith.constant 0 : i32
    %c0_i32_1 = arith.constant 0 : i32
    return %c0_i32, %c0_i32_0 : i32, i32
  }
  func.func @transform_2(%arg0: i32) -> (i32, i32, i32) {
    %c0_i32 = arith.constant 0 : i32
    %c0_i32_0 = arith.constant 0 : i32
    %c0_i32_1 = arith.constant 0 : i32
    return %arg0, %c0_i32, %c0_i32_0 : i32, i32, i32
  }
}

</mosaic_0001>

<bundles_post_ra>
// kernel: tpu_custom_call.1
= control target key start
LH: loop header
LB: loop body
LE: loop exit
PB: predicated region body
PF: predicated region fallthrough
CT: control target
= control target key end

     0   :  { %7 = vsyncpa [#allocation3], 0  ;;  %s779_s0 = inlined_call_operand.hbm [shape: f32[2,8,32], index: 0, kind: input, shape index: {}]   ;;  %s780_s1 = inlined_call_operand.hbm [shape: f32[32,384], index: 1, kind: input, shape index: {}]   ;;  %s781_s2 = inlined_call_operand.hbm [shape: f32[2,8,128], index: 2, kind: output, shape index: {}]  }
   0x1   :  { %9 = vsyncpa [#allocation3 + $0x1], 0 }
   0x2   :  { %10 = vsyncpa [#allocation6], 0 }
   0x3   :  { %11 = vsyncpa [#allocation4], 0 }
   0x4   :  { %13 = vsyncpa [#allocation4 + $0x1], 0  ;;  %s639_s9 = smov 0   ;;  %s641_s10 = smov 0  }
   0x5   :  { %s643_s11 = smov 0   ;;  %s645_s12 = smov 0  }
   0x6 LB: > { %s108_s15 = sshll.u32 %s780_s1, 4  ;;  %s663_s16 = sadd.s32 4294967295, %s619_s12   ;;  %s619_s12 = sphi %s645_s12, %s791_s12   ;;  %s615_s11 = sphi %s643_s11, %s790_s11   ;;  %s611_s10 = sphi %s641_s10, %s789_s10   ;;  %s607_s9 = sphi %s639_s9, %s788_s9   ;;  %s109_s15 = int_to_ptr.hbm [resolvable:$true] %s108_s15 }
   0x7   : > { %p409_p0 = scmp.ge.s32.totalorder %s619_s12, 1  ;;  %p40_p1 = scmp.eq.s32.totalorder %s663_s16, 0 }
   0x8   : > { %p97_p2 = scmp.lt.s32.totalorder %s619_s12, 3  ;;  %s621_s18 = smov [#allocation5]  }
   0x9   : > { %s110_s19 = sshll.u32 %s621_s18, 4  ;;  %s622_s20 = smov 384   ;;  %s111_s19 = int_to_ptr.vmem [resolvable:$true] %s110_s19 }
   0xa   : > { %p668_p3 = pnand %p409_p0, %p97_p2  ;;  %s623_s21 = smov 24  }
   0xb   : > { %s408_s22 = sadd.s32 4294967294, %s619_s12   ;;  %s679_s23 = sadd.s32 1, %s619_s12  }
   0xc   : > { %p434_p4 = pneg %p668_p3  ;;  %s26_s24 = sadd.s32 1, %s615_s11 }
   0xd   : > { %s23_s25 = ssub.s32 %s619_s12, %s679_s23  ;;  %p33_p7 = scmp.ne.s32.totalorder %s615_s11, %s611_s10 }
   0xe   : > { %p435_p6 = pnand %p434_p4, %p40_p1  ;;  %p24_p8 = scmp.eq.s32.totalorder %s23_s25, 0 }
   0xf   : > { %p34_p9 = scmp.eq.s32.totalorder %s619_s12, 0  ;;  %p39_p10 = scmp.ne.s32.totalorder %s611_s10, %s607_s9 }
  0x10   : > { %437 = dma.hbm_to_vmem [thread:$0]  (!%p435_p6), %s109_s15, 1536, %s111_s19, [#allocation6], %s622_s20, %s622_s20, %s623_s21  }
  0x11   : > { %p84_p11 = scmp.eq.s32.totalorder %s663_s16, 1  ;;  %p695_p12 = por %p40_p1, %p39_p10 }
  0x12   : > { %s691_s26 = scalar_select %p24_p8, %s615_s11, %s26_s24  }
  0x13   : > { %p699_p13 = por %p84_p11, %p33_p7  ;;  %p90_p0 = scmp.eq.s32.totalorder %s408_s22, 1 }
  0x14   : > { %p35_p2 = por %p34_p9, %p33_p7  ;;  %s124_s29 = sand.u32 1, %s615_s11  }
  0x15   : > { %p704_p4 = por %p90_p0, %p39_p10  ;;  %p447_p6 = scmp.lt.s32.totalorder %s619_s12, 2 }
  0x16   : > { %s412_s3 = sshll.u32 %s124_s29, 3  ;;  %s413_s4 = sshll.u32 %s619_s12, 3 }
  0x17   : > { %s132_s7 = scalar_lea.hbm %s779_s0, %s413_s4  ;;  %s128_s13 = scalar_lea.vmem [#allocation2], %s412_s3 }
  0x18   : > { %s134_s8 = sshll.u32 %s132_s7, 4  ;;  %s136_s14 = sshll.u32 %s128_s13, 4  ;;  %s135_s8 = int_to_ptr.hbm [resolvable:$true] %s134_s8  ;;  %s137_s14 = int_to_ptr.vmem [resolvable:$true] %s136_s14 }
  0x19   : > { %p713_p8 = pnand %p447_p6, %p35_p2  ;;  %s125_s18 = scalar_lea.sflag [#allocation3], %s124_s29 }
  0x1a   : > { %s519_s19 = sshra.s32 %s135_s8, 4  ;;  %s526_s24 = scalar_lea.hbm %s779_s0, 16  ;;  %s520_s19 = int_to_ptr.hbm [resolvable:$true] %s519_s19 }
  0x1b   : > { %s521_s20 = scalar_lea.hbm %s520_s19, 8  ;;  %p523_p9 = pneg %p713_p8 }
  0x1c   : > { %p522_p7 = scmp.ne.s32.totalorder %s520_s19, %s521_s20  ;;  %p527_p0 = scmp.lt.s32.totalorder %s520_s19, %s779_s0 }
  0x1d   : > { %p528_p2 = scmp.lt.s32.totalorder %s526_s24, %s521_s20 }
  0x1e   : > { %p524_p10 = pnand %p523_p9, %p522_p7 }
  0x1f   : > { %p529_p6 = por %p528_p2, %p527_p0 }
  0x20   : > { %p525_p11 = pneg %p524_p10 }
  0x22   : > { %p530_p5 = pnand %p529_p6, %p525_p11 }
  0x24   : > { %533 = shalt.err (!%p530_p5)
}
  0x25   : > { %441 = dma.hbm_to_vmem [thread:$0]  (!%p713_p8), %s135_s8, 128, %s137_s14, %s125_s18  }
  0x26   : > { %145 = sbr.rel (%p668_p3) target bundleno = 580 (0x244), region = 28  ;;  %s730_s29 = sand.u32 (!%p668_p3), 1, %s611_s10  }
  0x27   : > { %s415_s4 = sshll.u32 (!%p668_p3), %s730_s29, 3  ;;  %s148_s5 = scalar_lea.sflag (!%p668_p3), [#allocation3], %s730_s29 }
  0x28   : > { %s151_s6 = scalar_lea.vmem (!%p668_p3), [#allocation2], %s415_s4 }
  0x2b   : > { %594 = dma.done.wait (%p695_p12), %s148_s5, 128  }
  0x2c   : > { %596 = vsyncadd (%p695_p12), %s148_s5, 4294967168 }
  0x2d   : > { %598 = dma.done.wait (%p40_p1), [#allocation6], 1536  }
  0x2e   : > { %600 = vsyncadd (%p40_p1), [#allocation6], 4294965760  ;;  %v189_v0 = vld [vmem:[#allocation5 + $0x50] sm:$0xff]  ;;  %v188_v1 = vld [vmem:[#allocation5 + $0x48] sm:$0xff]  ;;  %vm191_vm0 = vcmask 261120   ;;  %vm276_vm1 = vcmask 64512  }
  0x2f   : > { %v186_v2 = vld [vmem:[#allocation5 + $0x38] sm:$0xff]  ;;  %227 = vmatpush.msra.mxu1 %v189_v0  ;;  %207 = vmatpush.msra.mxu0 %v188_v1  ;;  %v185_v3 = vld [vmem:[#allocation5 + $0x30] sm:$0xff]  ;;  %v183_v4 = vld [vmem:[#allocation5 + $0x20] sm:$0xff]  ;;  %s423_s17 = sshll.u32 %s663_s16, 3  ;;  %s177_s13 = scalar_lea.vmem [#allocation7], %s415_s4 }
  0x30   : > { %v182_v5 = vld [vmem:[#allocation5 + $0x18] sm:$0xff]  ;;  %v180_v6 = vld [vmem:[#allocation5 + $0x8] sm:$0xff]  ;;  %v179_v7 = vld [vmem:[#allocation5] sm:$0xff]  ;;  %s323_s8 = scalar_lea.hbm %s781_s2, %s423_s17  ;;  %s325_s14 = sshll.u32 %s177_s13, 4  ;;  %s326_s14 = int_to_ptr.vmem [resolvable:$true] %s325_s14 }
  0x31   : > { %228 = vmatpush.msra.mxu1 %v186_v2  ;;  %208 = vmatpush.msra.mxu0 %v185_v3  ;;  %v178_v8 = vld [vmem:[%s151_s6] sm:$0xff]  ;;  %v187_v10 = vld [vmem:[#allocation5 + $0x40] sm:$0xff]  ;;  %v184_v11 = vld [vmem:[#allocation5 + $0x28] sm:$0xff]  ;;  %s327_s15 = sshll.u32 %s323_s8, 4  ;;  %s313_s18 = scalar_lea.sflag [#allocation4], %s730_s29  ;;  %s328_s15 = int_to_ptr.hbm [resolvable:$true] %s327_s15 }
  0x32   : > { %v190_v9 = vld [vmem:[#allocation5 + $0x58] sm:$0xff]  ;;  %v181_v12 = vld [vmem:[#allocation5 + $0x10] sm:$0xff]  ;;  %s563_s19 = sshra.s32 %s328_s15, 4  ;;  %s569_s22 = scalar_lea.hbm %s781_s2, 16  ;;  %s564_s19 = int_to_ptr.hbm [resolvable:$true] %s563_s19 }
  0x33   : > { %229 = vmatpush.msra.mxu1 %v183_v4  ;;  %209 = vmatpush.msra.mxu0 %v182_v5  ;;  %s565_s16 = scalar_lea.hbm %s564_s19, 8  ;;  %p570_p12 = scmp.lt.s32.totalorder %s564_s19, %s781_s2 }
  0x34   : > { %247 = vmatpush.msra.mxu2 %v190_v9  ;;  %p566_p1 = scmp.ne.s32.totalorder %s564_s19, %s565_s16  ;;  %p571_p8 = scmp.lt.s32.totalorder %s569_s22, %s565_s16 }
  0x35   : > { %230 = vmatpush.msra.mxu1 %v180_v6  ;;  %210 = vmatpush.msra.mxu0 %v179_v7 }
  0x36   : > { %419 = vmatmul.msk.f32.vlgmr.msra.gmra.mxu1 %vm191_vm0, %v178_v8  ;;  %418 = vmatmul.msk.f32.vlgmr.msra.gmra.mxu0 %vm191_vm0, %v178_v8  ;;  %p567_p3 = pnand %p566_p1, %p699_p13  ;;  %p572_p7 = por %p571_p8, %p570_p12 }
  0x37   : > { %248 = vmatpush.msra.mxu2 %v187_v10 }
  0x38   : > { %p568_p5 = pneg %p567_p3 }
  0x39   : > { %249 = vmatpush.msra.mxu2 %v184_v11 }
  0x3a   : > { %p573_p9 = pnand %p572_p7, %p568_p5 }
  0x3b   : > { %250 = vmatpush.msra.mxu2 %v181_v12 }
  0x3c   : > { %420 = vmatmul.msk.f32.vlgmr.msra.gmra.mxu2 %vm191_vm0, %v178_v8 }
  0xb3   : > { %v232_v13 = vpop.f32.mrf.mxu1  ;;  %v212_v14 = vpop.f32.mrf.mxu0 }
  0xb4   : > { %v255_v15 = vmul.f32 0.17677669, %v212_v14  ;;  %271 = vmatpush.xpose.msra.mxu3 %v232_v13 }
  0xb7   : > { %272 = vmatmul.f32.vlgmr.msra.gmra.mxu3 %v255_v15 }
  0xbf   : > { %v252_v18 = vpop.f32.mrf.mxu2 }
  0xc0   : > { %304 = vmatpush.msrb.mxu3 %v252_v18 }
 0x13a   : > { %v273_v16 = vpop.f32.mrf.mxu3 }
 0x13b   : > { %v277_v17 = vsel %vm276_vm1, %v273_v16, -inf }
 0x13c   : > { %278 = vmax.xlane.f32.xlu0 %v277_v17 }
 0x1af   : > { %v279_v19 = vpop.xlane.xlu0 %278 }
 0x1b0   : > { %v280_v20 = vsub.f32 %v273_v16, %v279_v19 }
 0x1b2   : > { %v281_v21 = vmul.f32 1.442695, %v280_v20 }
 0x1b4   : > { %485 = vpow2.f32 %v281_v21 }
 0x1ba   : > { %v486_v22 = vpop.eup %485 }
 0x1bb   : > { %421 = vmatmul.msk.f32.vlgmr.msrb.gmra.mxu3 %vm276_vm1, %v486_v22  ;;  %v283_v23 = vsel %vm276_vm1, %v486_v22, 0.0 }
 0x1bc   : > { %284 = vadd.xlane.f32.xlu0 %v283_v23 }
 0x22f   : > { %v285_v24 = vpop.xlane.xlu0 %284 }
 0x230   : > { %487 = vrcp.f32 %v285_v24 }
 0x236   : > { %v488_v25 = vpop.eup %487 }
 0x23e   : > { %v306_v26 = vpop.f32.mrf.mxu3 }
 0x23f   : > { %v310_v27 = vmul.f32 %v488_v25, %v306_v26 }
 0x241   : > { %311 = vst [vmem:[%s177_s13] sm:$0xff] %v310_v27 }
 0x242   : > { %576 = shalt.err (!%p573_p9)
}
 0x243   : > { %432 = dma.vmem_to_hbm [thread:$0]  (%p699_p13), %s326_s14, 128, %s328_s15, %s313_s18  }
 0x244 PF: > { %s339_s3 = sand.u32 1, %s607_s9   ;;  %p787_p10 = scmp.ge.s32.totalorder %s619_s12, 2 }
 0x245   : > { %s340_s29 = scalar_lea.sflag [#allocation4], %s339_s3 }
 0x246   : > { %p443_p11 = pnand %p787_p10, %p704_p4 }
 0x248   : > { %p444_p0 = pneg %p443_p11 }
 0x24a   : > { %602 = dma.done.wait (%p444_p0), %s340_s29, 128  }
 0x24b   : > { %604 = vsyncadd (%p444_p0), %s340_s29, 4294967168  ;;  %p16_p2 = scmp.ge.s32.totalorder %s679_s23, 4   ;;  %s788_s9 = smov %s611_s10 }
 0x24c   : > { %s789_s10 = smov %s615_s11  ;;  %s790_s11 = smov %s691_s26 }
 0x24d   : > { %s791_s12 = smov %s679_s23  ;;  %18 = sbr.rel (!%p16_p2) target bundleno = 6 (0x6), region = 77 }
 0x252   :  { %346 = vsyncpa [#allocation3], 1 }
 0x253   :  { %348 = vsyncpa [#allocation3 + $0x1], 1 }
 0x254   :  { %349 = vsyncpa [#allocation6], 1 }
 0x255   :  { %350 = vsyncpa [#allocation4], 1 }
 0x256   :  { %352 = vsyncpa [#allocation4 + $0x1], 1 }

</bundles_post_ra>
